<compile_context>
chip_gen: v5e
topology: v5e:2x2
jax: 0.10.0
libtpu: 0.0.40
codegen_flags: <defaults>
</compile_context>

<pallas_src>
import jax
import jax.numpy as jnp
from jax import lax
from jax.experimental import pallas as pl
from jax.experimental.pallas import tpu as pltpu


def _round_up(x: int, m: int) -> int:
    return (x + m - 1) // m * m


def _largest_divisor_tile(dim: int, cap: int, quantum: int) -> int:
    """Largest multiple of `quantum` that is <= min(cap, dim) and divides dim (0 if none)."""
    hi = min(cap, dim)
    hi -= hi % quantum
    for cand in range(hi, 0, -quantum):
        if dim % cand == 0:
            return cand
    return 0


def _pick_mxu_tile(dim: int, cap: int) -> int:
    # Prefer multiples of 256 (v6e/v7x MXU is 2x256x256); fall back to 128 (v5e is 128x128).
    t = _largest_divisor_tile(dim, cap, 256)
    if t == 0:
        t = _largest_divisor_tile(dim, cap, 128)
    return t if t > 0 else dim


# x:(m,k) contracted with w:(n,k) on the last dim of each -> (m,n); W never transposed.
_CONTRACT_LAST = (((1,), (1,)), ((), ()))


def _linear_onepass_kernel(x_ref, w_ref, b_ref, o_ref):
    """Whole-K in one shot: gridless tiny path and single-K-tile tiled path."""
    acc = lax.dot_general(x_ref[...], w_ref[...], _CONTRACT_LAST,
                          preferred_element_type=jnp.float32)
    o_ref[...] = (acc + b_ref[...]).astype(o_ref.dtype)


def _linear_multik_kernel(x_ref, w_ref, b_ref, o_ref, acc_ref):
    """3-D grid (i, j, k): f32 accumulator resident across k, bias folded into the init."""
    k = pl.program_id(2)

    @pl.when(k == 0)
    def _():
        # Bias folded into the accumulator init: no extra VPU pass in the epilogue.
        acc_ref[...] = jnp.broadcast_to(b_ref[...], acc_ref.shape)

    acc_ref[...] += lax.dot_general(x_ref[...], w_ref[...], _CONTRACT_LAST,
                                    preferred_element_type=jnp.float32)

    @pl.when(k == pl.num_programs(2) - 1)
    def _():
        o_ref[...] = acc_ref[...].astype(o_ref.dtype)


def prepare_linear_params(w, b, *, compute_dtype=jnp.bfloat16):
    """One-time parameter prep (hoisted out of the per-call path).

    W stays in PyTorch (D_out, D_in) layout -- no transpose -- and both dims are
    zero-padded once to multiples of 128; bias becomes a lane-dense f32 row.
    """
    d_out, d_in = w.shape
    cdt = jnp.dtype(compute_dtype)
    n_pad = _round_up(d_out, 128)
    k_pad = _round_up(d_in, 128)
    wp = jnp.zeros((n_pad, k_pad), cdt).at[:d_out, :d_in].set(w.astype(cdt))
    bp = jnp.zeros((1, n_pad), jnp.float32).at[0, :d_out].set(b.astype(jnp.float32))
    return {"w": wp, "b": bp, "d_in": d_in, "d_out": d_out, "compute_dtype": cdt}


def linear_forward(x, params, *, tm_cap=512, tn_cap=1024, tk_cap=512,
                   small_bytes=4 << 20):
    """y = x @ W^T + b with parameters prepared once by prepare_linear_params."""
    B, d_in = x.shape
    assert d_in == params["d_in"], (d_in, params["d_in"])
    d_out = params["d_out"]
    out_dtype = x.dtype
    cdt = params["compute_dtype"]
    wp, bp = params["w"], params["b"]
    N, K = wp.shape

    cdt_size = cdt.itemsize
    out_size = jnp.dtype(out_dtype).itemsize

    # Sublane packing: 8 rows for 32-bit, 16 for bf16, 32 for int8.
    sub = 8 * max(1, 4 // cdt_size)
    M = _round_up(B, sub)
    xp = jnp.zeros((M, K), cdt).at[:B, :d_in].set(x.astype(cdt))

    # --- tiny / dispatch-dominated problems: one gridless call, everything in VMEM ---
    whole_bytes = (M * K + N * K) * cdt_size + N * 4 + M * N * out_size
    if whole_bytes <= small_bytes:
        out = pl.pallas_call(
            _linear_onepass_kernel,
            out_shape=jax.ShapeDtypeStruct((M, N), out_dtype),
            in_specs=[pl.BlockSpec(memory_space=pltpu.MemorySpace.VMEM)] * 3,
            out_specs=pl.BlockSpec(memory_space=pltpu.MemorySpace.VMEM),
        )(xp, wp, bp)
        return out[:B, :d_out]

    # --- tiled paths (tiles divide the padded dims; no re-rounding) ---
    tm = _largest_divisor_tile(M, tm_cap, sub) or M
    tn = _pick_mxu_tile(N, tn_cap)
    tk = _pick_mxu_tile(K, tk_cap)

    footprint = (2 * (tm * tk + tn * tk) * cdt_size   # double-buffered x / W tiles
                 + 2 * tn * 4                          # bias tile
                 + tm * tn * 4                         # f32 accumulator
                 + 2 * tm * tn * out_size)             # double-buffered output tile
    assert footprint <= (48 << 20), (
        f"tile footprint {footprint / 2**20:.1f} MiB exceeds the 48 MiB cap "
        "(v7x has 64 MiB VMEM); lower tm_cap/tn_cap/tk_cap")

    cost = pl.CostEstimate(
        flops=2 * M * N * K, transcendentals=0,
        bytes_accessed=(M * K + N * K) * cdt_size + N * 4 + M * N * out_size)

    if K == tk:
        # Single K tile: write straight to the output block, no scratch, no pl.when.
        out = pl.pallas_call(
            _linear_onepass_kernel,
            out_shape=jax.ShapeDtypeStruct((M, N), out_dtype),
            grid_spec=pltpu.PrefetchScalarGridSpec(
                num_scalar_prefetch=0,
                grid=(M // tm, N // tn),
                in_specs=[
                    pl.BlockSpec((tm, K), lambda i, j: (i, 0)),   # x tile
                    pl.BlockSpec((tn, K), lambda i, j: (j, 0)),   # W tile (PyTorch layout)
                    pl.BlockSpec((1, tn), lambda i, j: (0, j)),   # bias row
                ],
                out_specs=pl.BlockSpec((tm, tn), lambda i, j: (i, j)),
            ),
            compiler_params=pltpu.CompilerParams(
                dimension_semantics=("parallel", "parallel"),
                vmem_limit_bytes=48 << 20),
            cost_estimate=cost,
        )(xp, wp, bp)
    else:
        out = pl.pallas_call(
            _linear_multik_kernel,
            out_shape=jax.ShapeDtypeStruct((M, N), out_dtype),
            grid_spec=pltpu.PrefetchScalarGridSpec(
                num_scalar_prefetch=0,
                grid=(M // tm, N // tn, K // tk),
                in_specs=[
                    pl.BlockSpec((tm, tk), lambda i, j, k: (i, k)),   # x tile
                    pl.BlockSpec((tn, tk), lambda i, j, k: (j, k)),   # W tile (PyTorch layout)
                    pl.BlockSpec((1, tn), lambda i, j, k: (0, j)),    # bias row (resident per j)
                ],
                out_specs=pl.BlockSpec((tm, tn), lambda i, j, k: (i, j)),
                scratch_shapes=[pltpu.VMEM((tm, tn), jnp.float32)],
            ),
            compiler_params=pltpu.CompilerParams(
                dimension_semantics=("parallel", "parallel", "arbitrary"),
                vmem_limit_bytes=48 << 20),
            cost_estimate=cost,
        )(xp, wp, bp)

    return out[:B, :d_out]


if __name__ == "__main__":
    input_dim = 10
    output_dim = 1
    batch_size = 32

    key = jax.random.PRNGKey(0)
    kx, kw, kb = jax.random.split(key, 3)

    # Input, matching torch.randn(batch_size, input_dim).
    x = jax.random.normal(kx, (batch_size, input_dim), dtype=jnp.float32)

    # nn.Linear default init: U(-1/sqrt(fan_in), 1/sqrt(fan_in)), PyTorch (D_out, D_in) layout.
    bound = 1.0 / (input_dim ** 0.5)
    w = jax.random.uniform(kw, (output_dim, input_dim), minval=-bound, maxval=bound,
                           dtype=jnp.float32)
    b = jax.random.uniform(kb, (output_dim,), minval=-bound, maxval=bound,
                           dtype=jnp.float32)

    y_ref = x @ w.T + b

    # Exact f32 path (tight numerical check).
    params_f32 = prepare_linear_params(w, b, compute_dtype=jnp.float32)
    y_f32 = jax.block_until_ready(linear_forward(x, params_f32))
    assert y_f32.shape == (batch_size, output_dim)
    assert jnp.allclose(y_f32, y_ref, atol=1e-5, rtol=1e-5)

    # Default bf16-operand / f32-accumulate path (expected small precision loss).
    params_bf16 = prepare_linear_params(w, b)
    y_bf16 = jax.block_until_ready(linear_forward(x, params_bf16))
    assert y_bf16.shape == (batch_size, output_dim)
    assert jnp.allclose(y_bf16, y_ref, atol=5e-2, rtol=5e-2)

    print("KERNEL_OK")
</pallas_src>

<mosaic_0001>
module attributes {stable_mosaic.version = 11 : i64} {
  func.func @_linear_onepass_kernel(%arg0: memref<32x128xf32, #tpu.memory_space<vmem>>, %arg1: memref<128x128xf32, #tpu.memory_space<vmem>>, %arg2: memref<1x128xf32, #tpu.memory_space<vmem>>, %arg3: memref<32x128xf32, #tpu.memory_space<vmem>>) attributes {dimension_semantics = [], scalar_prefetch = 0 : i64, scratch_operands = 0 : i64, tpu.core_type = #tpu.core_type<tc>} {
    %c0 = arith.constant 0 : index
    %c0_0 = arith.constant 0 : index
    %0 = vector.load %arg0[%c0, %c0_0] : memref<32x128xf32, #tpu.memory_space<vmem>>, vector<32x128xf32>
    %c0_1 = arith.constant 0 : index
    %c0_2 = arith.constant 0 : index
    %1 = vector.load %arg1[%c0_1, %c0_2] : memref<128x128xf32, #tpu.memory_space<vmem>>, vector<128x128xf32>
    %cst = arith.constant dense<0.000000e+00> : vector<32x128xf32>
    %2 = tpu.matmul %0, %1, %cst {dimension_numbers = #tpu.dot_dimension_numbers<[1], [1], [0], [0], [0, 0, 1, 0], [], []>} : vector<32x128xf32>, vector<128x128xf32>, vector<32x128xf32> -> vector<32x128xf32>
    %c0_3 = arith.constant 0 : index
    %c0_4 = arith.constant 0 : index
    %3 = vector.load %arg2[%c0_3, %c0_4] : memref<1x128xf32, #tpu.memory_space<vmem>>, vector<1x128xf32>
    %4 = vector.broadcast %3 : vector<1x128xf32> to vector<32x128xf32>
    %5 = arith.addf %2, %4 : vector<32x128xf32>
    %c0_5 = arith.constant 0 : index
    %c0_6 = arith.constant 0 : index
    %6 = vector.load %arg3[%c0_5, %c0_6] : memref<32x128xf32, #tpu.memory_space<vmem>>, vector<32x128xf32>
    tpu.vector_store %arg3[%c0_5, %c0_6], %5 {strides = array<i32>} : memref<32x128xf32, #tpu.memory_space<vmem>>, vector<32x128xf32>,
    return
  }
}

</mosaic_0001>

<bundles_post_ra>
// kernel: tpu_custom_call.1
= control target key start
LH: loop header
LB: loop body
LE: loop exit
PB: predicated region body
PF: predicated region fallthrough
CT: control target
= control target key end

     0   :  { %8 = vsyncpa [#allocation3], 0  ;;  %s302_s0 = inlined_call_operand.hbm [shape: f32[32,128], index: 0, kind: input, shape index: {}]   ;;  %s303_s1 = inlined_call_operand.hbm [shape: f32[128,128], index: 1, kind: input, shape index: {}]   ;;  %s304_s2 = inlined_call_operand.vmem [shape: f32[1,128], index: 2, kind: input, shape index: {}]   ;;  %s305_s3 = inlined_call_operand.hbm [shape: f32[32,128], index: 3, kind: output, shape index: {}]  }
   0x1   :  { %9 = vsyncpa [#allocation6], 0 }
   0x2   :  { %10 = vsyncpa [#allocation4], 0  ;;  %s15_s14 = sshll.u32 %s302_s0, 4  ;;  %s256_s15 = smov [#allocation2]   ;;  %s16_s14 = int_to_ptr.hbm [resolvable:$true] %s15_s14 }
   0x3   :  { %s17_s16 = sshll.u32 %s256_s15, 4  ;;  %s28_s19 = sshll.u32 %s303_s1, 4  ;;  %s18_s16 = int_to_ptr.vmem [resolvable:$true] %s17_s16  ;;  %s29_s19 = int_to_ptr.hbm [resolvable:$true] %s28_s19 }
   0x4   :  { %s257_s20 = smov 128   ;;  %s258_s21 = smov 8  }
   0x5   :  { %23 = dma.hbm_to_vmem [thread:$0]  %s16_s14, 512, %s18_s16, [#allocation3], %s257_s20, %s257_s20, %s258_s21  }
   0x6   :  { %s259_s22 = smov [#allocation5]  }
   0x7   :  { %s30_s23 = sshll.u32 %s259_s22, 4  ;;  %s31_s23 = int_to_ptr.vmem [resolvable:$true] %s30_s23 }
   0x8   :  { %36 = dma.hbm_to_vmem [thread:$0]  %s29_s19, 2048, %s31_s23, [#allocation6], %s257_s20, %s257_s20, %s258_s21  }
   0x9   :  { %250 = dma.done.wait [#allocation3], 512  }
   0xa   :  { %251 = vsyncadd [#allocation3], 4294966784 }
   0xb   :  { %252 = dma.done.wait [#allocation6], 2048  }
   0xc   :  { %253 = vsyncadd [#allocation6], 4294965248  ;;  %v66_v0 = vld [vmem:[#allocation5 + $0x78] sm:$0xff]  ;;  %v65_v1 = vld [vmem:[#allocation5 + $0x70] sm:$0xff]  ;;  %s260_s24 = smov [#allocation7]   ;;  %s110_s28 = sshll.u32 %s305_s3, 4  ;;  %s111_s28 = int_to_ptr.hbm [resolvable:$true] %s110_s28 }
   0xd   :  { %125 = vmatpush.xpose.msra.mxu2 %v66_v0  ;;  %126 = vmatpush.xpose.msra.mxu3 %v66_v0  ;;  %v64_v2 = vld [vmem:[#allocation5 + $0x68] sm:$0xff]  ;;  %v63_v3 = vld [vmem:[#allocation5 + $0x60] sm:$0xff]  ;;  %v62_v4 = vld [vmem:[#allocation5 + $0x58] sm:$0xff]  ;;  %s108_s25 = sshll.u32 %s260_s24, 4  ;;  %s109_s25 = int_to_ptr.vmem [resolvable:$true] %s108_s25 }
   0xe   :  { %71 = vmatpush.xpose.msra.mxu0 %v66_v0  ;;  %124 = vmatpush.xpose.msra.mxu1 %v66_v0  ;;  %v61_v5 = vld [vmem:[#allocation5 + $0x50] sm:$0xff]  ;;  %v60_v6 = vld [vmem:[#allocation5 + $0x48] sm:$0xff]  ;;  %v59_v7 = vld [vmem:[#allocation5 + $0x40] sm:$0xff] }
   0xf   :  { %v58_v8 = vld [vmem:[#allocation5 + $0x38] sm:$0xff]  ;;  %v57_v9 = vld [vmem:[#allocation5 + $0x30] sm:$0xff]  ;;  %v56_v10 = vld [vmem:[#allocation5 + $0x28] sm:$0xff] }
  0x10   :  { %v55_v11 = vld [vmem:[#allocation5 + $0x20] sm:$0xff]  ;;  %v54_v12 = vld [vmem:[#allocation5 + $0x18] sm:$0xff]  ;;  %v53_v13 = vld [vmem:[#allocation5 + $0x10] sm:$0xff] }
  0x11   :  { %128 = vmatpush.xpose.msra.mxu2 %v65_v1  ;;  %129 = vmatpush.xpose.msra.mxu3 %v65_v1  ;;  %v52_v14 = vld [vmem:[#allocation5 + $0x8] sm:$0xff]  ;;  %v51_v15 = vld [vmem:[#allocation5] sm:$0xff]  ;;  %v49_v16 = vld [vmem:[#allocation2 + $0x10] sm:$0xff] }
  0x12   :  { %72 = vmatpush.xpose.msra.mxu0 %v65_v1  ;;  %127 = vmatpush.xpose.msra.mxu1 %v65_v1  ;;  %v50_v17 = vld [vmem:[#allocation2 + $0x18] sm:$0xff]  ;;  %v47_v18 = vld [vmem:[#allocation2] sm:$0xff]  ;;  %v48_v19 = vld [vmem:[#allocation2 + $0x8] sm:$0xff] }
  0x13   :  { %v177_v20 = vld [vmem:[%s304_s2] ss:$0 sm:$0xff] }
  0x15   :  { %131 = vmatpush.xpose.msra.mxu2 %v64_v2  ;;  %132 = vmatpush.xpose.msra.mxu3 %v64_v2 }
  0x16   :  { %73 = vmatpush.xpose.msra.mxu0 %v64_v2  ;;  %130 = vmatpush.xpose.msra.mxu1 %v64_v2 }
  0x19   :  { %134 = vmatpush.xpose.msra.mxu2 %v63_v3  ;;  %135 = vmatpush.xpose.msra.mxu3 %v63_v3 }
  0x1a   :  { %74 = vmatpush.xpose.msra.mxu0 %v63_v3  ;;  %133 = vmatpush.xpose.msra.mxu1 %v63_v3 }
  0x1d   :  { %137 = vmatpush.xpose.msra.mxu2 %v62_v4  ;;  %138 = vmatpush.xpose.msra.mxu3 %v62_v4 }
  0x1e   :  { %75 = vmatpush.xpose.msra.mxu0 %v62_v4  ;;  %136 = vmatpush.xpose.msra.mxu1 %v62_v4 }
  0x21   :  { %140 = vmatpush.xpose.msra.mxu2 %v61_v5  ;;  %141 = vmatpush.xpose.msra.mxu3 %v61_v5 }
  0x22   :  { %76 = vmatpush.xpose.msra.mxu0 %v61_v5  ;;  %139 = vmatpush.xpose.msra.mxu1 %v61_v5 }
  0x25   :  { %143 = vmatpush.xpose.msra.mxu2 %v60_v6  ;;  %144 = vmatpush.xpose.msra.mxu3 %v60_v6 }
  0x26   :  { %77 = vmatpush.xpose.msra.mxu0 %v60_v6  ;;  %142 = vmatpush.xpose.msra.mxu1 %v60_v6 }
  0x29   :  { %146 = vmatpush.xpose.msra.mxu2 %v59_v7  ;;  %147 = vmatpush.xpose.msra.mxu3 %v59_v7 }
  0x2a   :  { %78 = vmatpush.xpose.msra.mxu0 %v59_v7  ;;  %145 = vmatpush.xpose.msra.mxu1 %v59_v7 }
  0x2d   :  { %149 = vmatpush.xpose.msra.mxu2 %v58_v8  ;;  %150 = vmatpush.xpose.msra.mxu3 %v58_v8 }
  0x2e   :  { %79 = vmatpush.xpose.msra.mxu0 %v58_v8  ;;  %148 = vmatpush.xpose.msra.mxu1 %v58_v8 }
  0x31   :  { %152 = vmatpush.xpose.msra.mxu2 %v57_v9  ;;  %153 = vmatpush.xpose.msra.mxu3 %v57_v9 }
  0x32   :  { %80 = vmatpush.xpose.msra.mxu0 %v57_v9  ;;  %151 = vmatpush.xpose.msra.mxu1 %v57_v9 }
  0x35   :  { %155 = vmatpush.xpose.msra.mxu2 %v56_v10  ;;  %156 = vmatpush.xpose.msra.mxu3 %v56_v10 }
  0x36   :  { %81 = vmatpush.xpose.msra.mxu0 %v56_v10  ;;  %154 = vmatpush.xpose.msra.mxu1 %v56_v10 }
  0x39   :  { %158 = vmatpush.xpose.msra.mxu2 %v55_v11  ;;  %159 = vmatpush.xpose.msra.mxu3 %v55_v11 }
  0x3a   :  { %82 = vmatpush.xpose.msra.mxu0 %v55_v11  ;;  %157 = vmatpush.xpose.msra.mxu1 %v55_v11 }
  0x3d   :  { %161 = vmatpush.xpose.msra.mxu2 %v54_v12  ;;  %162 = vmatpush.xpose.msra.mxu3 %v54_v12 }
  0x3e   :  { %83 = vmatpush.xpose.msra.mxu0 %v54_v12  ;;  %160 = vmatpush.xpose.msra.mxu1 %v54_v12 }
  0x41   :  { %164 = vmatpush.xpose.msra.mxu2 %v53_v13  ;;  %165 = vmatpush.xpose.msra.mxu3 %v53_v13 }
  0x42   :  { %84 = vmatpush.xpose.msra.mxu0 %v53_v13  ;;  %163 = vmatpush.xpose.msra.mxu1 %v53_v13 }
  0x45   :  { %167 = vmatpush.xpose.msra.mxu2 %v52_v14  ;;  %168 = vmatpush.xpose.msra.mxu3 %v52_v14 }
  0x46   :  { %85 = vmatpush.xpose.msra.mxu0 %v52_v14  ;;  %166 = vmatpush.xpose.msra.mxu1 %v52_v14 }
  0x49   :  { %170 = vmatpush.xpose.msra.mxu2 %v51_v15  ;;  %171 = vmatpush.xpose.msra.mxu3 %v51_v15 }
  0x4a   :  { %86 = vmatpush.xpose.msra.mxu0 %v51_v15  ;;  %169 = vmatpush.xpose.msra.mxu1 %v51_v15 }
  0x4c   :  { %93 = vmatmul.f32.vlgmr.msra.gmra.mxu2 %v49_v16  ;;  %96 = vmatmul.f32.vlgmr.msra.gmra.mxu3 %v50_v17 }
  0x4d   :  { %87 = vmatmul.f32.vlgmr.msra.gmra.mxu0 %v47_v18  ;;  %90 = vmatmul.f32.vlgmr.msra.gmra.mxu1 %v48_v19 }
  0xca   :  { %v88_v21 = vpop.f32.mrf.mxu0  ;;  %v91_v22 = vpop.f32.mrf.mxu1 }
  0xcb   :  { %v89_v23 = vadd.f32 %v177_v20, %v88_v21  ;;  %v92_v24 = vadd.f32 %v177_v20, %v91_v22 }
  0xcd   :  { %100 = vst [vmem:[#allocation7] sm:$0xff] %v89_v23 }
  0xce   :  { %101 = vst [vmem:[#allocation7 + $0x8] sm:$0xff] %v92_v24 }
  0xcf   :  { %v94_v25 = vpop.f32.mrf.mxu2  ;;  %v97_v26 = vpop.f32.mrf.mxu3 }
  0xd0   :  { %v95_v27 = vadd.f32 %v177_v20, %v94_v25  ;;  %v98_v28 = vadd.f32 %v177_v20, %v97_v26 }
  0xd2   :  { %102 = vst [vmem:[#allocation7 + $0x10] sm:$0xff] %v95_v27 }
  0xd3   :  { %103 = vst [vmem:[#allocation7 + $0x18] sm:$0xff] %v98_v28 }
  0xd4   :  { %116 = dma.vmem_to_hbm [thread:$0]  %s109_s25, 512, %s111_s28, [#allocation4], %s257_s20, %s257_s20, %s258_s21  }
  0xd5   :  { %254 = dma.done.wait [#allocation4], 512  }
  0xd6   :  { %255 = vsyncadd [#allocation4], 4294966784 }
  0xd7   :  { %121 = vsyncpa [#allocation3], 1 }
  0xd8   :  { %122 = vsyncpa [#allocation6], 1 }
  0xd9   :  { %123 = vsyncpa [#allocation4], 1 }

</bundles_post_ra>
